<compile_context>
chip_gen: v7x
topology: tpu7x:2x2x1
jax: 0.10.0
libtpu: 0.0.40
codegen_flags: <defaults>
</compile_context>

<pallas_src>
import functools

import jax
import jax.numpy as jnp
from jax.experimental import pallas as pl
from jax.experimental.pallas import tpu as pltpu


def _hw_budgets():
    """(x-tile byte budget, vmem_limit_bytes), generation-aware.

    v7x has only 64 MiB physical VMEM per TC -> keep 2x(x tile) + small
    buffers under ~40 MiB.  v5e/v6e have 128 MiB -> 16 MiB tiles / 64 MiB
    limit.  Unknown chips fall back to the conservative (v7x-safe) numbers.
    """
    cap = None
    try:
        info = pltpu.get_tpu_info()
        cap = getattr(info, "vmem_capacity_bytes", None)
    except Exception:
        cap = None
    if cap is None or cap <= 64 * 1024 * 1024:
        return 8 * 1024 * 1024, 40 * 1024 * 1024
    return 16 * 1024 * 1024, 64 * 1024 * 1024


def _choose_tile_b(batch, d, budget_bytes):
    """Pick batch-tile size TB purely by bytes (TB * D * 4).

    * Whole batch in one grid step whenever x fits the budget (block equals
      the full array, so no (8,128) alignment needed).
    * Otherwise TB is a multiple of 128 so the lane-dense (1, TB) blocks
      satisfy the (8,128) constraint; the last tile is ragged (no input pad).
    """
    bytes_per_row = 4 * max(d, 1)
    if batch * bytes_per_row <= budget_bytes:
        return batch
    rows = budget_bytes // bytes_per_row
    return max((rows // 128) * 128, 128)


def _predict_kernel(x_ref, w_ref, b_ref, o_ref):
    # (1, D) contracted with (TB, D) on D -> (1, TB), lane-dense, on the MXU
    # (free filler here); avoids a (TB,1)->(1,TB) sublane->lane relayout.
    logits = jax.lax.dot_general(
        w_ref[...], x_ref[...],
        dimension_numbers=(((1,), (1,)), ((), ())),
        preferred_element_type=jnp.float32)               # (1, TB)
    o_ref[...] = jax.nn.sigmoid(logits + b_ref[0]).astype(o_ref.dtype)


def _loss_kernel(x_ref, w_ref, b_ref, y_ref, o_ref, *, n_valid):
    # Per-tile partial sum of squared error, written to this tile's own
    # (1, 128) output block (lane 0 holds the sum) -> grid axis 'parallel'.
    i = pl.program_id(0)
    tb = x_ref.shape[0]
    logits = jax.lax.dot_general(
        w_ref[...], x_ref[...],
        dimension_numbers=(((1,), (1,)), ((), ())),
        preferred_element_type=jnp.float32)               # (1, TB)
    y_pred = jax.nn.sigmoid(logits + b_ref[0])
    lane = jax.lax.broadcasted_iota(jnp.int32, (1, tb), 1)
    valid = (i * tb + lane) < n_valid                     # masks ragged tail
    diff = jnp.where(valid, y_pred - y_ref[...], jnp.float32(0.0))
    tile_sum = jnp.sum(diff * diff)
    out_lane = jax.lax.broadcasted_iota(jnp.int32, (1, 128), 1)
    o_ref[...] = jnp.where(out_lane == 0, tile_sum, jnp.float32(0.0))


def torch_model_forward(x, w, b, y=None, *, tile_budget_bytes=None):
    """Pallas equivalent of TorchModel.forward.

    x: (B, D) float32
    w: (1, D) float32 — nn.Linear(input_size, 1).weight
    b: (1,)   float32 — nn.Linear(input_size, 1).bias
    y: optional (B, 1) float32 targets -> returns scalar MSE loss
    """
    B, D = x.shape
    x = x.astype(jnp.float32)
    w = w.reshape(1, D).astype(jnp.float32)
    b1 = b.reshape(1).astype(jnp.float32)

    budget, vmem_limit = _hw_budgets()
    if tile_budget_bytes is not None:
        budget = tile_budget_bytes
    TB = _choose_tile_b(B, D, budget)
    num_tiles = pl.cdiv(B, TB)

    x_spec = pl.BlockSpec((TB, D), lambda i: (i, 0))
    w_spec = pl.BlockSpec((1, D), lambda i: (0, 0))
    b_spec = pl.BlockSpec(memory_space=pltpu.MemorySpace.SMEM)

    if y is None:
        out = pl.pallas_call(
            _predict_kernel,
            out_shape=jax.ShapeDtypeStruct((1, num_tiles * TB), jnp.float32),
            grid=(num_tiles,),
            in_specs=[x_spec, w_spec, b_spec],
            out_specs=pl.BlockSpec((1, TB), lambda i: (0, i)),
            compiler_params=pltpu.CompilerParams(
                dimension_semantics=("parallel",),
                vmem_limit_bytes=vmem_limit),
        )(x, w, b1)
        return out[0, :B].reshape(B, 1)

    # (B, 1) -> (1, B) is a pure flatten (same memory order): cheap layout
    # plumbing so the in-kernel compare is lane-dense with no relayout.
    y_row = y.astype(jnp.float32).reshape(1, B)
    partials = pl.pallas_call(
        functools.partial(_loss_kernel, n_valid=B),
        out_shape=jax.ShapeDtypeStruct((1, num_tiles * 128), jnp.float32),
        grid=(num_tiles,),
        in_specs=[x_spec, w_spec, b_spec,
                  pl.BlockSpec((1, TB), lambda i: (0, i))],
        out_specs=pl.BlockSpec((1, 128), lambda i: (0, i)),
        compiler_params=pltpu.CompilerParams(
            dimension_semantics=("parallel",),
            vmem_limit_bytes=vmem_limit),
    )(x, w, b1, y_row)
    return jnp.sum(partials) / jnp.float32(B)


if __name__ == "__main__":
    key = jax.random.PRNGKey(0)

    def init_params(kw, kb, d):
        # PyTorch nn.Linear default init: U(-1/sqrt(D), 1/sqrt(D))
        bound = 1.0 / jnp.sqrt(jnp.float32(d))
        w = jax.random.uniform(kw, (1, d), jnp.float32, -bound, bound)
        bias = jax.random.uniform(kb, (1,), jnp.float32, -bound, bound)
        return w, bias

    # Small shapes consistent with the module: batch=8, input_size=32.
    B, D = 8, 32
    kx, ky, kw, kb, key = jax.random.split(key, 5)
    x = jax.random.normal(kx, (B, D), dtype=jnp.float32)
    y = jax.random.uniform(ky, (B, 1), dtype=jnp.float32)
    w, bias = init_params(kw, kb, D)

    y_pred = torch_model_forward(x, w, bias)      # inference path
    jax.block_until_ready(y_pred)
    loss = torch_model_forward(x, w, bias, y)     # training path (scalar loss)
    jax.block_until_ready(loss)

    ref_pred = jax.nn.sigmoid(x @ w.T + bias.reshape(1, 1))
    ref_loss = jnp.mean((ref_pred - y) ** 2)
    assert y_pred.shape == (B, 1)
    assert jnp.allclose(y_pred, ref_pred, atol=1e-5), "prediction mismatch"
    assert jnp.allclose(loss, ref_loss, atol=1e-5), "loss mismatch"

    # Multi-tile / ragged-last-tile path, forced via a tiny tile budget so the
    # test stays small: B=2056, D=40 -> TB=384, 6 tiles, last tile 136 valid
    # rows, no wrapper-side padding of x or y.
    B2, D2 = 2056, 40
    kx2, ky2, kw2, kb2, key = jax.random.split(key, 5)
    x2 = jax.random.normal(kx2, (B2, D2), dtype=jnp.float32)
    y2 = jax.random.uniform(ky2, (B2, 1), dtype=jnp.float32)
    w2, bias2 = init_params(kw2, kb2, D2)

    small_budget = 64 * 1024
    y_pred2 = torch_model_forward(x2, w2, bias2, tile_budget_bytes=small_budget)
    loss2 = torch_model_forward(x2, w2, bias2, y2, tile_budget_bytes=small_budget)
    jax.block_until_ready((y_pred2, loss2))

    ref_pred2 = jax.nn.sigmoid(x2 @ w2.T + bias2.reshape(1, 1))
    ref_loss2 = jnp.mean((ref_pred2 - y2) ** 2)
    assert jnp.allclose(y_pred2, ref_pred2, atol=1e-5), "tiled prediction mismatch"
    assert jnp.allclose(loss2, ref_loss2, atol=1e-4), "tiled loss mismatch"

    print("KERNEL_OK")
</pallas_src>

<mosaic_0001>
module attributes {stable_mosaic.version = 11 : i64} {
  func.func @_predict_kernel(%arg0: i32, %arg1: memref<8x32xf32, #tpu.memory_space<vmem>>, %arg2: memref<1x32xf32, #tpu.memory_space<vmem>>, %arg3: memref<1xf32, #tpu.memory_space<smem>>, %arg4: memref<1x8xf32, #tpu.memory_space<vmem>>) attributes {dimension_semantics = [#tpu.dimension_semantics<parallel>], iteration_bounds = array<i64: 1>, scalar_prefetch = 0 : i64, scratch_operands = 0 : i64, tpu.core_type = #tpu.core_type<tc>, window_params = [{transform_indices = @transform_0, window_bounds = array<i64: 8, 32>}, {pipeline_mode = #tpu.pipeline_mode<synchronous>, transform_indices = @transform_1, window_bounds = array<i64: 1, 32>}, {transform_indices = @transform_2, window_bounds = array<i64: 1>}, {transform_indices = @transform_3, window_bounds = array<i64: 1, 8>}]} {
    %c0 = arith.constant 0 : index
    %c0_0 = arith.constant 0 : index
    %0 = vector.load %arg2[%c0, %c0_0] : memref<1x32xf32, #tpu.memory_space<vmem>>, vector<1x32xf32>
    %c0_1 = arith.constant 0 : index
    %c0_2 = arith.constant 0 : index
    %1 = vector.load %arg1[%c0_1, %c0_2] : memref<8x32xf32, #tpu.memory_space<vmem>>, vector<8x32xf32>
    %cst = arith.constant dense<0.000000e+00> : vector<1x8xf32>
    %2 = tpu.matmul %0, %1, %cst {dimension_numbers = #tpu.dot_dimension_numbers<[1], [1], [0], [0], [0, 0, 1, 0], [], []>} : vector<1x32xf32>, vector<8x32xf32>, vector<1x8xf32> -> vector<1x8xf32>
    %c0_3 = arith.constant 0 : index
    %3 = memref.load %arg3[%c0_3] : memref<1xf32, #tpu.memory_space<smem>>
    %4 = vector.broadcast %3 : f32 to vector<1x8xf32>
    %5 = arith.addf %2, %4 : vector<1x8xf32>
    %6 = arith.negf %5 : vector<1x8xf32>
    %7 = math.exp %6 : vector<1x8xf32>
    %cst_4 = arith.constant 1.000000e+00 : f32
    %8 = vector.broadcast %cst_4 : f32 to vector<1x8xf32>
    %9 = arith.addf %8, %7 : vector<1x8xf32>
    %10 = arith.divf %8, %9 : vector<1x8xf32>
    %c0_5 = arith.constant 0 : index
    %c0_6 = arith.constant 0 : index
    %11 = vector.load %arg4[%c0_5, %c0_6] : memref<1x8xf32, #tpu.memory_space<vmem>>, vector<1x8xf32>
    tpu.vector_store %arg4[%c0_5, %c0_6], %10 {strides = array<i32>} : memref<1x8xf32, #tpu.memory_space<vmem>>, vector<1x8xf32>,
    return
  }
  func.func @transform_0(%arg0: i32) -> (i32, i32) {
    %c0_i32 = arith.constant 0 : i32
    %c0_i32_0 = arith.constant 0 : i32
    return %arg0, %c0_i32 : i32, i32
  }
  func.func @transform_1(%arg0: i32) -> (i32, i32) {
    %c0_i32 = arith.constant 0 : i32
    %c0_i32_0 = arith.constant 0 : i32
    %c0_i32_1 = arith.constant 0 : i32
    return %c0_i32, %c0_i32_0 : i32, i32
  }
  func.func @transform_2(%arg0: i32) -> i32 {
    %c0_i32 = arith.constant 0 : i32
    %c0_i32_0 = arith.constant 0 : i32
    return %c0_i32 : i32
  }
  func.func @transform_3(%arg0: i32) -> (i32, i32) {
    %c0_i32 = arith.constant 0 : i32
    %c0_i32_0 = arith.constant 0 : i32
    return %c0_i32, %arg0 : i32, i32
  }
}

</mosaic_0001>

<bundles_post_ra>
// kernel: tpu_custom_call.1
= control target key start
LH: loop header
LB: loop body
LE: loop exit
PB: predicated region body
PF: predicated region fallthrough
CT: control target
= control target key end

     0   :  { %9 = vsyncpa [#allocation4], 0  ;;  %s252_s0 = inlined_call_operand.hbm [shape: f32[8,32], index: 0, kind: input, shape index: {}]   ;;  %s253_s1 = inlined_call_operand.vmem [shape: f32[1,32], index: 1, kind: input, shape index: {}]   ;;  %s254_s2 = inlined_call_operand.<no memory space> [shape: f32[1], index: 2, kind: input, shape index: {}]   ;;  %s255_s3 = inlined_call_operand.hbm [shape: f32[1,8], index: 3, kind: output, shape index: {}]  }
   0x1   :  { %10 = vsyncpa [#allocation5], 0  ;;  %s198_s12 = smov [#allocation3]   ;;  %s150_s16 = scalar_lea.hbm %s252_s0, 128 }
   0x2   :  { %s17_s13 = sshll.u32 %s198_s12, 4  ;;  %p151_p0 = scmp.ne.s32.totalorder %s252_s0, %s150_s16  ;;  %s18_s13 = int_to_ptr.vmem [resolvable:$true] %s17_s13 }
   0x3   :  { %p154_p1 = scmp.lt.u32.totalorder %s150_s16, %s252_s0 }
   0x5   :  { %p156_p2 = pnand %p154_p1, %p151_p0 }
   0x7   :  { %159 = shalt.err (!%p156_p2)
}
   0x8   :  { %s160_s21 = scalar_lea.vmem %s18_s13, 128  ;;  %p165_p4 = scmp.lt.s32.totalorder %s18_s13, %s18_s13 }
   0x9   :  { %p161_p3 = scmp.ne.s32.totalorder %s18_s13, %s160_s21  ;;  %p166_p5 = scmp.lt.s32.totalorder %s160_s21, %s160_s21 }
   0xb   :  { %p167_p6 = por %p166_p5, %p165_p4 }
   0xd   :  { %p168_p7 = pnand %p167_p6, %p161_p3 }
   0xf   :  { %171 = shalt.err (!%p168_p7)
}
  0x10   :  { %20 = dma.hbm_to_vmem [thread:$0]  %s252_s0, 128, %s18_s13, [#allocation4]  }
  0x11   :  { %194 = dma.done.wait [#allocation4], 128  }
  0x12   :  { %195 = vsyncadd [#allocation4], 4294967168  ;;  %v199_v0 = vmov 0.0   ;;  %vm200_vm0 = vmmov 0   ;;  %vm32_vm1 = vcmask 261120   ;;  %v29_v1 = vld [vmem:[#allocation3] sm:$0xff]  ;;  %v31_v3 = vstv %s254_s2 }
  0x13   :  { %137 = vmatprep.subr.mxu0 %v199_v0  ;;  %139 = vmatprep.mubr.msk.f32.mxu0 %vm200_vm0, %v199_v0  ;;  %v28_v2 = vld [vmem:[%s253_s1] sm:$0x1]  ;;  %s201_s0 = smov [#allocation6]   ;;  %vm115_vm2 = vcmask 57344  }
  0x14   :  { %138 = vmatpush3.xpose.msk.msra.mxu0 %vm32_vm1, %v29_v1  ;;  %s123_s28 = sshll.u32 %s201_s0, 4  ;;  %s124_s28 = int_to_ptr.vmem [resolvable:$true] %s123_s28 }
  0x15   :  { %s172_s1 = scalar_lea.vmem %s124_s28, 16  ;;  %s176_s29 = scalar_lea.vmem %s124_s28, 32 }
  0x16   :  { %p173_p8 = scmp.ne.s32.totalorder %s124_s28, %s172_s1  ;;  %p177_p9 = scmp.lt.s32.totalorder %s124_s28, %s124_s28 }
  0x17   :  { %140 = vmatmul.mubr.msk.f32.vlgmr.msra.gmra.mrb[0].mxu0 %vm32_vm1, %v28_v2  ;;  %p178_p10 = scmp.lt.s32.totalorder %s176_s29, %s172_s1 }
  0x19   :  { %p179_p11 = por %p178_p10, %p177_p9 }
  0x1b   :  { %p180_p12 = pnand %p179_p11, %p173_p8 }
  0xea   :  { %v105_v4 = vpop.f32.mrb[0].mxu0 }
  0xeb   :  { %v106_v5 = vadd.f32 %v105_v4, %v31_v3  ;;  %v141_v6 = vpop.f32.mrb[1].mxu0 }
  0xed   :  { %v134_v7 = vmul.f32 -1.442695, %v106_v5 }
  0xef   :  { %146 = vpow2.f32 %v134_v7 }
  0xf9   :  { %v147_v8 = vpop.eup %146 }
  0xfa   :  { %v112_v9 = vadd.f32 1.0, %v147_v8 }
  0xfc   :  { %148 = vrcp.f32 %v112_v9 }
 0x106   :  { %v149_v10 = vpop.eup %148 }
 0x107   :  { %116 = vst.msk [vmem:[#allocation6] sm:$0x1] %vm115_vm2, %v149_v10 }
 0x108   :  { %183 = shalt.err (!%p180_p12)
}
 0x109   :  { %s184_s4 = scalar_lea.hbm %s255_s3, 16 }
 0x10a   :  { %p185_p13 = scmp.ne.s32.totalorder %s255_s3, %s184_s4  ;;  %p188_p0 = scmp.lt.u32.totalorder %s184_s4, %s255_s3 }
 0x10c   :  { %p190_p1 = pnand %p188_p0, %p185_p13 }
 0x10e   :  { %193 = shalt.err (!%p190_p1)
}
 0x10f   :  { %126 = dma.vmem_to_hbm [thread:$0]  %s124_s28, 16, %s255_s3, [#allocation5]  }
 0x110   :  { %196 = dma.done.wait [#allocation5], 16  }
 0x111   :  { %197 = vsyncadd [#allocation5], 4294967280 }
 0x112   :  { %130 = vsyncpa [#allocation4], 1 }
 0x113   :  { %131 = vsyncpa [#allocation5], 1 }

</bundles_post_ra>
